<compile_context>
chip_gen: v7x
topology: tpu7x:2x2x1
jax: 0.10.0
libtpu: 0.0.40
codegen_flags: <defaults>
</compile_context>

<pallas_src>
import numpy as np
import jax
import jax.numpy as jnp
from jax.experimental import pallas as pl
from jax.experimental.pallas import tpu as pltpu

_SELU_ALPHA = 1.6732632423543772
_SELU_SCALE = 1.0507009873554805


# ------------------------------ Pallas kernel --------------------------------
def _selu(x):
    # exp of min(x, 0) avoids overflow on the unused positive branch.
    neg = _SELU_ALPHA * (jnp.exp(jnp.minimum(x, 0.0)) - 1.0)
    return _SELU_SCALE * jnp.where(x > 0.0, x, neg)


def _network_fwd_kernel(xf_ref, c1_ref, m_ref, wfc_ref, bfc_ref, out_ref):
    # xf_ref : (C, B, Cin*L)   per-channel flattened input (channel-major flatten)
    # c1_ref : (C, Cin*L, Co1*L)   conv1 folded to a dense matrix
    # m_ref  : (C, Co1*L, A)       conv2 + flatten + T^T folded to a dense matrix
    # wfc_ref: (A, OUT), bfc_ref: (1, OUT), out_ref: (B, OUT)
    num_channels = xf_ref.shape[0]
    tl = None
    for c in range(num_channels):                    # static unroll (C = 2)
        h1 = jnp.dot(xf_ref[c], c1_ref[c],
                     preferred_element_type=jnp.float32)        # (B, Co1*L)
        h1 = _selu(h1)                                          # SELU (f32)
        y_t = jnp.dot(h1, m_ref[c],
                      preferred_element_type=jnp.float32)       # (B, A) == y_c^T
        w = 2.0 if c == 0 else 1.0                   # tl_features aliasing: 2*y0 + y1 + ...
        tl = w * y_t if tl is None else tl + w * y_t
    out_ref[...] = (jnp.dot(tl, wfc_ref[...],
                            preferred_element_type=jnp.float32)
                    + bfc_ref[...])                             # fc(tl.t())


def network_forward(x, folded):
    """x: (B, C, Cin, L) f32 -> out1: (B, out_feats)."""
    B, C = x.shape[0], x.shape[1]
    fin = x.shape[2] * x.shape[3]
    out_feats = folded["wfc_t"].shape[1]
    # channel-major flatten of each x[:, c] (matches x.view(B, -1) inside Transform)
    xf = jnp.transpose(x, (1, 0, 2, 3)).reshape(C, B, fin)
    vmem = pl.BlockSpec(memory_space=pltpu.MemorySpace.VMEM)
    return pl.pallas_call(
        _network_fwd_kernel,
        out_shape=jax.ShapeDtypeStruct((B, out_feats), jnp.float32),
        in_specs=[vmem, vmem, vmem, vmem, vmem],
        out_specs=vmem,
    )(xf, folded["c1"], folded["m"], folded["wfc_t"], folded["bfc"])


# -------------------- offline parameter folding (host side) -------------------
def fold_transform_params(T1, T2, Tm, L):
    """Fold the linear ops around SELU into dense per-channel matrices.

    Flatten convention everywhere is channel-major / position-minor, exactly
    like `tensor.view(B, -1)` on (B, C, L) tensors.
      h1_flat = x_flat @ C1_c            (conv1, SAME pad, no bias)
      y_c^T   = selu(h1_flat) @ M_c      (conv2 -> flatten -> T_c @ (.)^T)
    """
    T1 = np.asarray(T1, np.float32)      # (C, Co1, Cin, K)
    T2 = np.asarray(T2, np.float32)      # (C, Co2, Co1, K)
    Tm = np.asarray(Tm, np.float32)      # (C, A, Co2*L)
    C, CO1, CIN, K = T1.shape
    CO2 = T2.shape[1]
    A = Tm.shape[1]
    P = K // 2
    c1_list, m_list = [], []
    for c in range(C):
        # conv1: h1[co, l] += T1[co, ci, k] * x[ci, l + k - P]
        c1 = np.zeros((CIN, L, CO1, L), np.float32)
        for k in range(K):
            for l in range(L):
                m = l + k - P
                if 0 <= m < L:
                    c1[:, m, :, l] += T1[c, :, :, k].T          # (Cin, Co1)
        c1_list.append(c1.reshape(CIN * L, CO1 * L))

        # conv2 + flatten + T:  y[a] += T2[o, ci, k] * T_c[a, o*L + l] * h1[ci, p],
        # with l = p - k + P
        t3 = Tm[c].reshape(A, CO2, L)
        mfold = np.zeros((CO1, L, A), np.float32)
        for k in range(K):
            for p in range(L):
                l = p - k + P
                if 0 <= l < L:
                    mfold[:, p, :] += np.einsum("oc,ao->ca", T2[c, :, :, k], t3[:, :, l])
        m_list.append(mfold.reshape(CO1 * L, A))
    return jnp.asarray(np.stack(c1_list)), jnp.asarray(np.stack(m_list))


# ---------------------------- pure-JAX reference ------------------------------
def reference_forward(x, T1, T2, Tm, Wfc, bfc):
    B, C, CIN, L = x.shape
    outp = []
    for c in range(C):
        xc = x[:, c]                                            # (B, Cin, L)
        h1 = jax.lax.conv_general_dilated(
            xc, T1[c], window_strides=(1,), padding="SAME",
            dimension_numbers=("NCH", "OIH", "NCH"),
            precision=jax.lax.Precision.HIGHEST)
        h1 = jax.nn.selu(h1)
        h2 = jax.lax.conv_general_dilated(
            h1, T2[c], window_strides=(1,), padding="SAME",
            dimension_numbers=("NCH", "OIH", "NCH"),
            precision=jax.lax.Precision.HIGHEST)
        y = jnp.dot(Tm[c], h2.reshape(B, -1).T,
                    precision=jax.lax.Precision.HIGHEST)        # (A, B)
        outp.append(y)
    tl = 2.0 * outp[0]                     # in-place "+=" aliasing doubles channel 0
    for c in range(1, C):
        tl = tl + outp[c]
    return jnp.dot(tl.T, Wfc.T, precision=jax.lax.Precision.HIGHEST) + bfc


# ------------------------------------ main ------------------------------------
if __name__ == "__main__":
    # Module defaults: out_planes1=8, out_planes2=16, ksize=3, no maxpool,
    # num_channels=2, activ='selu', atom_ratio=0.5, of_fc=2.
    B, C, CIN, L = 2, 2, 4, 16
    CO1, CO2, K = 8, 16, 3
    NUM_FEATURES = CO2 * L                       # 256
    NUM_ATOMS = int(NUM_FEATURES * 0.5 * C)      # 256
    OUT_FEATS = NUM_ATOMS // 2                   # 128

    key = jax.random.PRNGKey(0)
    kx, k1, k2, k3, k4, k5 = jax.random.split(key, 6)
    x = jax.random.normal(kx, (B, C, CIN, L), jnp.float32)
    T1 = 0.3 * jax.random.normal(k1, (C, CO1, CIN, K), jnp.float32)   # conv1 weights
    T2 = 0.2 * jax.random.normal(k2, (C, CO2, CO1, K), jnp.float32)   # conv2 weights
    Tm = 0.05 * jax.random.normal(k3, (C, NUM_ATOMS, NUM_FEATURES), jnp.float32)
    Wfc = 0.05 * jax.random.normal(k4, (OUT_FEATS, NUM_ATOMS), jnp.float32)
    bfc = 0.1 * jax.random.normal(k5, (OUT_FEATS,), jnp.float32)

    c1_fold, m_fold = fold_transform_params(T1, T2, Tm, L)
    folded = {
        "c1": c1_fold,                              # (C, Cin*L, Co1*L)   = (2, 64, 128)
        "m": m_fold,                                # (C, Co1*L, A)       = (2, 128, 256)
        "wfc_t": jnp.asarray(Wfc).T,                # (A, OUT)            = (256, 128)
        "bfc": jnp.asarray(bfc).reshape(1, OUT_FEATS),
    }

    fwd = jax.jit(lambda xx: network_forward(xx, folded))
    out = fwd(x)
    jax.block_until_ready(out)

    ref = reference_forward(x, T1, T2, Tm, Wfc, bfc)

    assert out.shape == (B, OUT_FEATS), out.shape
    assert bool(jnp.all(jnp.isfinite(out)))
    assert bool(jnp.allclose(out, ref, atol=5e-2, rtol=5e-2)), \
        f"max abs err = {float(jnp.max(jnp.abs(out - ref)))}"

    print("KERNEL_OK")
</pallas_src>

<mosaic_0001>
module attributes {stable_mosaic.version = 11 : i64} {
  func.func @_network_fwd_kernel(%arg0: memref<2x2x64xf32, #tpu.memory_space<vmem>>, %arg1: memref<2x64x128xf32, #tpu.memory_space<vmem>>, %arg2: memref<2x128x256xf32, #tpu.memory_space<vmem>>, %arg3: memref<256x128xf32, #tpu.memory_space<vmem>>, %arg4: memref<1x128xf32, #tpu.memory_space<vmem>>, %arg5: memref<2x128xf32, #tpu.memory_space<vmem>>) attributes {dimension_semantics = [], scalar_prefetch = 0 : i64, scratch_operands = 0 : i64, tpu.core_type = #tpu.core_type<tc>} {
    %c0 = arith.constant 0 : index
    %c0_0 = arith.constant 0 : index
    %c0_1 = arith.constant 0 : index
    %0 = vector.load %arg0[%c0, %c0_0, %c0_1] : memref<2x2x64xf32, #tpu.memory_space<vmem>>, vector<1x2x64xf32>
    %1 = vector.shape_cast %0 : vector<1x2x64xf32> to vector<2x64xf32>
    %c0_2 = arith.constant 0 : index
    %c0_3 = arith.constant 0 : index
    %c0_4 = arith.constant 0 : index
    %2 = vector.load %arg1[%c0_2, %c0_3, %c0_4] : memref<2x64x128xf32, #tpu.memory_space<vmem>>, vector<1x64x128xf32>
    %3 = vector.shape_cast %2 : vector<1x64x128xf32> to vector<64x128xf32>
    %cst = arith.constant dense<0.000000e+00> : vector<2x128xf32>
    %4 = tpu.matmul %1, %3, %cst {dimension_numbers = #tpu.dot_dimension_numbers<[1], [0], [0], [1], [0, 0, 1, 1], [], []>} : vector<2x64xf32>, vector<64x128xf32>, vector<2x128xf32> -> vector<2x128xf32>
    %cst_5 = arith.constant 0.000000e+00 : f32
    %5 = vector.broadcast %cst_5 : f32 to vector<2x128xf32>
    %6 = arith.minimumf %4, %5 : vector<2x128xf32>
    %7 = math.exp %6 : vector<2x128xf32>
    %cst_6 = arith.constant 1.000000e+00 : f32
    %8 = vector.broadcast %cst_6 : f32 to vector<2x128xf32>
    %9 = arith.subf %7, %8 : vector<2x128xf32>
    %cst_7 = arith.constant 1.67326319 : f32
    %10 = vector.broadcast %cst_7 : f32 to vector<2x128xf32>
    %11 = arith.mulf %10, %9 : vector<2x128xf32>
    %cst_8 = arith.constant 0.000000e+00 : f32
    %12 = vector.broadcast %cst_8 : f32 to vector<2x128xf32>
    %13 = arith.cmpf ogt, %4, %12 : vector<2x128xf32>
    %14 = arith.select %13, %4, %11 : vector<2x128xi1>, vector<2x128xf32>
    %cst_9 = arith.constant 1.05070102 : f32
    %15 = vector.broadcast %cst_9 : f32 to vector<2x128xf32>
    %16 = arith.mulf %15, %14 : vector<2x128xf32>
    %c0_10 = arith.constant 0 : index
    %c0_11 = arith.constant 0 : index
    %c0_12 = arith.constant 0 : index
    %17 = vector.load %arg2[%c0_10, %c0_11, %c0_12] : memref<2x128x256xf32, #tpu.memory_space<vmem>>, vector<1x128x256xf32>
    %18 = vector.shape_cast %17 : vector<1x128x256xf32> to vector<128x256xf32>
    %cst_13 = arith.constant dense<0.000000e+00> : vector<2x256xf32>
    %19 = tpu.matmul %16, %18, %cst_13 {dimension_numbers = #tpu.dot_dimension_numbers<[1], [0], [0], [1], [0, 0, 1, 1], [], []>} : vector<2x128xf32>, vector<128x256xf32>, vector<2x256xf32> -> vector<2x256xf32>
    %cst_14 = arith.constant 2.000000e+00 : f32
    %20 = vector.broadcast %cst_14 : f32 to vector<2x256xf32>
    %21 = arith.mulf %20, %19 : vector<2x256xf32>
    %c1 = arith.constant 1 : index
    %c0_15 = arith.constant 0 : index
    %c0_16 = arith.constant 0 : index
    %22 = vector.load %arg0[%c1, %c0_15, %c0_16] : memref<2x2x64xf32, #tpu.memory_space<vmem>>, vector<1x2x64xf32>
    %23 = vector.shape_cast %22 : vector<1x2x64xf32> to vector<2x64xf32>
    %c1_17 = arith.constant 1 : index
    %c0_18 = arith.constant 0 : index
    %c0_19 = arith.constant 0 : index
    %24 = vector.load %arg1[%c1_17, %c0_18, %c0_19] : memref<2x64x128xf32, #tpu.memory_space<vmem>>, vector<1x64x128xf32>
    %25 = vector.shape_cast %24 : vector<1x64x128xf32> to vector<64x128xf32>
    %cst_20 = arith.constant dense<0.000000e+00> : vector<2x128xf32>
    %26 = tpu.matmul %23, %25, %cst_20 {dimension_numbers = #tpu.dot_dimension_numbers<[1], [0], [0], [1], [0, 0, 1, 1], [], []>} : vector<2x64xf32>, vector<64x128xf32>, vector<2x128xf32> -> vector<2x128xf32>
    %cst_21 = arith.constant 0.000000e+00 : f32
    %27 = vector.broadcast %cst_21 : f32 to vector<2x128xf32>
    %28 = arith.minimumf %26, %27 : vector<2x128xf32>
    %29 = math.exp %28 : vector<2x128xf32>
    %cst_22 = arith.constant 1.000000e+00 : f32
    %30 = vector.broadcast %cst_22 : f32 to vector<2x128xf32>
    %31 = arith.subf %29, %30 : vector<2x128xf32>
    %cst_23 = arith.constant 1.67326319 : f32
    %32 = vector.broadcast %cst_23 : f32 to vector<2x128xf32>
    %33 = arith.mulf %32, %31 : vector<2x128xf32>
    %cst_24 = arith.constant 0.000000e+00 : f32
    %34 = vector.broadcast %cst_24 : f32 to vector<2x128xf32>
    %35 = arith.cmpf ogt, %26, %34 : vector<2x128xf32>
    %36 = arith.select %35, %26, %33 : vector<2x128xi1>, vector<2x128xf32>
    %cst_25 = arith.constant 1.05070102 : f32
    %37 = vector.broadcast %cst_25 : f32 to vector<2x128xf32>
    %38 = arith.mulf %37, %36 : vector<2x128xf32>
    %c1_26 = arith.constant 1 : index
    %c0_27 = arith.constant 0 : index
    %c0_28 = arith.constant 0 : index
    %39 = vector.load %arg2[%c1_26, %c0_27, %c0_28] : memref<2x128x256xf32, #tpu.memory_space<vmem>>, vector<1x128x256xf32>
    %40 = vector.shape_cast %39 : vector<1x128x256xf32> to vector<128x256xf32>
    %cst_29 = arith.constant dense<0.000000e+00> : vector<2x256xf32>
    %41 = tpu.matmul %38, %40, %cst_29 {dimension_numbers = #tpu.dot_dimension_numbers<[1], [0], [0], [1], [0, 0, 1, 1], [], []>} : vector<2x128xf32>, vector<128x256xf32>, vector<2x256xf32> -> vector<2x256xf32>
    %cst_30 = arith.constant 1.000000e+00 : f32
    %42 = vector.broadcast %cst_30 : f32 to vector<2x256xf32>
    %43 = arith.mulf %42, %41 : vector<2x256xf32>
    %44 = arith.addf %21, %43 : vector<2x256xf32>
    %c0_31 = arith.constant 0 : index
    %c0_32 = arith.constant 0 : index
    %45 = vector.load %arg3[%c0_31, %c0_32] : memref<256x128xf32, #tpu.memory_space<vmem>>, vector<256x128xf32>
    %cst_33 = arith.constant dense<0.000000e+00> : vector<2x128xf32>
    %46 = tpu.matmul %44, %45, %cst_33 {dimension_numbers = #tpu.dot_dimension_numbers<[1], [0], [0], [1], [0, 0, 1, 1], [], []>} : vector<2x256xf32>, vector<256x128xf32>, vector<2x128xf32> -> vector<2x128xf32>
    %c0_34 = arith.constant 0 : index
    %c0_35 = arith.constant 0 : index
    %47 = vector.load %arg4[%c0_34, %c0_35] : memref<1x128xf32, #tpu.memory_space<vmem>>, vector<1x128xf32>
    %48 = vector.broadcast %47 : vector<1x128xf32> to vector<2x128xf32>
    %49 = arith.addf %46, %48 : vector<2x128xf32>
    %c0_36 = arith.constant 0 : index
    %c0_37 = arith.constant 0 : index
    %50 = vector.load %arg5[%c0_36, %c0_37] : memref<2x128xf32, #tpu.memory_space<vmem>>, vector<2x128xf32>
    tpu.vector_store %arg5[%c0_36, %c0_37], %49 {strides = array<i32>} : memref<2x128xf32, #tpu.memory_space<vmem>>, vector<2x128xf32>,
    return
  }
}

</mosaic_0001>

<bundles_post_ra>
// kernel: _lambda_.1
= control target key start
LH: loop header
LB: loop body
LE: loop exit
PB: predicated region body
PF: predicated region fallthrough
CT: control target
= control target key end

     0   :  { %10 = vsyncpa [#allocation3], 0  ;;  %s1022_s0 = inlined_call_operand.vmem [shape: f32[2,2,64], index: 0, kind: input, shape index: {}]   ;;  %s1023_s1 = inlined_call_operand.hbm [shape: f32[2,64,128], index: 1, kind: input, shape index: {}]   ;;  %s1024_s2 = inlined_call_operand.hbm [shape: f32[2,128,256], index: 2, kind: input, shape index: {}]   ;;  %s1025_s3 = inlined_call_operand.hbm [shape: f32[256,128], index: 3, kind: input, shape index: {}]   ;;  %s1026_s4 = inlined_call_operand.vmem [shape: f32[1,128], index: 4, kind: input, shape index: {}]   ;;  %s1027_s5 = inlined_call_operand.hbm [shape: f32[2,128], index: 5, kind: output, shape index: {}]  }
   0x1   :  { %11 = vsyncpa [#allocation6], 0 }
   0x2   :  { %12 = vsyncpa [#allocation4], 0  ;;  %s908_s18 = smov [#allocation5]   ;;  %s814_s22 = scalar_lea.hbm %s1024_s2, 8192 }
   0x3   :  { %s32_s19 = sshll.u32 %s908_s18, 4  ;;  %p815_p0 = scmp.ne.s32.totalorder %s1024_s2, %s814_s22  ;;  %s33_s19 = int_to_ptr.vmem [resolvable:$true] %s32_s19 }
   0x4   :  { %p818_p1 = scmp.lt.u32.totalorder %s814_s22, %s1024_s2 }
   0x6   :  { %p820_p2 = pnand %p818_p1, %p815_p0 }
   0x8   :  { %823 = shalt.err (!%p820_p2)
}
   0x9   :  { %s824_s27 = scalar_lea.vmem %s33_s19, 8192  ;;  %p829_p4 = scmp.lt.s32.totalorder %s33_s19, %s33_s19 }
   0xa   :  { %p825_p3 = scmp.ne.s32.totalorder %s33_s19, %s824_s27  ;;  %p830_p5 = scmp.lt.s32.totalorder %s824_s27, %s824_s27 }
   0xc   :  { %p831_p6 = por %p830_p5, %p829_p4 }
   0xe   :  { %p832_p7 = pnand %p831_p6, %p825_p3 }
  0x10   :  { %835 = shalt.err (!%p832_p7)
}
  0x11   :  { %s909_s28 = smov 256   ;;  %s910_s29 = smov 16  }
  0x12   :  { %38 = dma.hbm_to_vmem [thread:$0]  %s1024_s2, 8192, %s33_s19, [#allocation6], %s909_s28, %s909_s28, %s910_s29  }
  0x13   :  { %s911_s7 = smov [#allocation2]   ;;  %s836_s11 = scalar_lea.hbm %s1023_s1, 2048 }
  0x14   :  { %s20_s8 = sshll.u32 %s911_s7, 4  ;;  %p837_p8 = scmp.ne.s32.totalorder %s1023_s1, %s836_s11  ;;  %s21_s8 = int_to_ptr.vmem [resolvable:$true] %s20_s8 }
  0x15   :  { %p840_p9 = scmp.lt.u32.totalorder %s836_s11, %s1023_s1 }
  0x17   :  { %p842_p10 = pnand %p840_p9, %p837_p8 }
  0x19   :  { %845 = shalt.err (!%p842_p10)
}
  0x1a   :  { %s846_s16 = scalar_lea.vmem %s21_s8, 2048  ;;  %p851_p12 = scmp.lt.s32.totalorder %s21_s8, %s21_s8 }
  0x1b   :  { %p847_p11 = scmp.ne.s32.totalorder %s21_s8, %s846_s16  ;;  %p852_p13 = scmp.lt.s32.totalorder %s846_s16, %s846_s16 }
  0x1d   :  { %p853_p0 = por %p852_p13, %p851_p12 }
  0x1f   :  { %p854_p1 = pnand %p853_p0, %p847_p11 }
  0x21   :  { %857 = shalt.err (!%p854_p1)
}
  0x22   :  { %s912_s2 = smov 128   ;;  %s913_s17 = smov 8  }
  0x23   :  { %26 = dma.hbm_to_vmem [thread:$0]  %s1023_s1, 2048, %s21_s8, [#allocation3], %s912_s2, %s912_s2, %s913_s17  }
  0x24   :  { %s914_s20 = smov [#allocation7]   ;;  %s858_s24 = scalar_lea.hbm %s1025_s3, 4096 }
  0x25   :  { %s44_s21 = sshll.u32 %s914_s20, 4  ;;  %p859_p2 = scmp.ne.s32.totalorder %s1025_s3, %s858_s24  ;;  %s45_s21 = int_to_ptr.vmem [resolvable:$true] %s44_s21 }
  0x26   :  { %p862_p3 = scmp.lt.u32.totalorder %s858_s24, %s1025_s3 }
  0x28   :  { %p864_p4 = pnand %p862_p3, %p859_p2 }
  0x2a   :  { %867 = shalt.err (!%p864_p4)
}
  0x2b   :  { %s868_s29 = scalar_lea.vmem %s45_s21, 4096  ;;  %p873_p6 = scmp.lt.s32.totalorder %s45_s21, %s45_s21 }
  0x2c   :  { %p869_p5 = scmp.ne.s32.totalorder %s45_s21, %s868_s29  ;;  %p874_p7 = scmp.lt.s32.totalorder %s868_s29, %s868_s29 }
  0x2e   :  { %p875_p8 = por %p874_p7, %p873_p6 }
  0x30   :  { %p876_p9 = pnand %p875_p8, %p869_p5 }
  0x32   :  { %879 = shalt.err (!%p876_p9)
}
  0x33   :  { %50 = dma.hbm_to_vmem [thread:$0]  %s1025_s3, 4096, %s45_s21, [#allocation6], %s912_s2, %s912_s2, %s913_s17  }
  0x34   :  { %902 = dma.done.wait [#allocation3], 2048  }
  0x35   :  { %903 = vsyncadd [#allocation3], 4294965248 }
  0x36   :  { %904 = dma.done.wait [#allocation6], 12288  }
  0x37   :  { %905 = vsyncadd [#allocation6], 4294955008  ;;  %v915_v0 = vmov 0.0|0.0   ;;  %vm916_vm0 = vmmov 0   ;;  %v917_v1 = vmov 0.0   ;;  %v63_v2 = vld [vmem:[#allocation2] sm:$0xff] }
  0x38   :  { %679 = vmatprep.subr.bf16.mxu0 %v915_v0  ;;  %657 = vmatprep.mubr.msk.f32.mxu0 %vm916_vm0, %v917_v1  ;;  %v64_v3 = vld [vmem:[#allocation2 + $0x8] sm:$0xff]  ;;  %v65_v4 = vld [vmem:[#allocation2 + $0x10] sm:$0xff]  ;;  %v66_v6 = vld [vmem:[#allocation2 + $0x18] sm:$0xff]  ;;  %vm71_vm1 = vcmask 523264   ;;  %s918_s10 = smov [#allocation8]  }
  0x39   :  { %249 = vmatprep.mubr.f32.mxu1 %v917_v1  ;;  %v680_v5 = vpack.c.bf16 %v64_v3, %v63_v2  ;;  %v683_v7 = vpack.c.bf16 %v66_v6, %v65_v4  ;;  %v67_v8 = vld [vmem:[#allocation2 + $0x20] sm:$0xff]  ;;  %v68_v9 = vld [vmem:[#allocation2 + $0x28] sm:$0xff]  ;;  %v69_v10 = vld [vmem:[#allocation2 + $0x30] sm:$0xff]  ;;  %s572_s11 = sshll.u32 %s918_s10, 4  ;;  %s573_s11 = int_to_ptr.vmem [resolvable:$true] %s572_s11 }
  0x3a   :  { %v70_v11 = vld [vmem:[#allocation2 + $0x38] sm:$0xff]  ;;  %v154_v12 = vld [vmem:[#allocation5 + $0x8] sm:$0xff]  ;;  %v153_v14 = vld [vmem:[#allocation5] sm:$0xff]  ;;  %v686_v15 = vpack.c.bf16 %v68_v9, %v67_v8  ;;  %s880_s12 = scalar_lea.vmem %s573_s11, 32  ;;  %p885_p11 = scmp.lt.s32.totalorder %s573_s11, %s573_s11 }
  0x3b   :  { %681 = vmatpush3.bf16.msra.mxu0 %v680_v5  ;;  %v156_v13 = vld [vmem:[#allocation5 + $0x18] sm:$0xff]  ;;  %v155_v17 = vld [vmem:[#allocation5 + $0x10] sm:$0xff]  ;;  %v158_v18 = vld [vmem:[#allocation5 + $0x28] sm:$0xff]  ;;  %v689_v27 = vpack.c.bf16 %v70_v11, %v69_v10  ;;  %p881_p10 = scmp.ne.s32.totalorder %s573_s11, %s880_s12  ;;  %p886_p12 = scmp.lt.s32.totalorder %s880_s12, %s880_s12 }
  0x3c   :  { %682 = vmatprep.subr.bf16.mxu0 %v915_v0  ;;  %v691_v16 = vpack.c.bf16 %v156_v13, %v154_v12  ;;  %v160_v19 = vld [vmem:[#allocation5 + $0x38] sm:$0xff]  ;;  %v693_v20 = vpack.c.bf16 %v155_v17, %v153_v14  ;;  %v157_v22 = vld [vmem:[#allocation5 + $0x20] sm:$0xff]  ;;  %v159_v23 = vld [vmem:[#allocation5 + $0x30] sm:$0xff] }
  0x3d   :  { %v695_v21 = vpack.c.bf16 %v160_v19, %v158_v18  ;;  %v162_v24 = vld [vmem:[#allocation5 + $0x48] sm:$0xff]  ;;  %v164_v25 = vld [vmem:[#allocation5 + $0x58] sm:$0xff]  ;;  %v697_v26 = vpack.c.bf16 %v159_v23, %v157_v22  ;;  %v261_v29 = vld [vmem:[#allocation2 + $0x40] sm:$0xff]  ;;  %p887_p13 = por %p886_p12, %p885_p11 }
  0x3e   :  { %692 = vmatprep.subr.bf16.mxu1 %v691_v16  ;;  %v699_v28 = vpack.c.bf16 %v164_v25, %v162_v24  ;;  %v262_v30 = vld [vmem:[#allocation2 + $0x48] sm:$0xff]  ;;  %v62_v31 = vld [vmem:[%s1022_s0] sm:$0x3]  ;;  %v263_v33 = vld [vmem:[#allocation2 + $0x50] sm:$0xff] }
  0x3f   :  { %684 = vmatpush3.bf16.msra.mxu0 %v683_v7  ;;  %694 = vmatpush1.bf16.msra.mxu1 %v693_v20  ;;  %v724_v32 = vpack.c.bf16 %v262_v30, %v261_v29  ;;  %v264_v34 = vld [vmem:[#allocation2 + $0x58] sm:$0xff]  ;;  %v265_v36 = vld [vmem:[#allocation2 + $0x60] sm:$0xff]  ;;  %v266_v37 = vld [vmem:[#allocation2 + $0x68] sm:$0xff]  ;;  %p888_p0 = pnand %p887_p13, %p881_p10 }
  0x40   :  { %685 = vmatprep.subr.bf16.mxu0 %v915_v0  ;;  %696 = vmatprep.subr.bf16.mxu1 %v695_v21  ;;  %v727_v35 = vpack.c.bf16 %v264_v34, %v263_v33  ;;  %v730_v38 = vpack.c.bf16 %v266_v37, %v265_v36  ;;  %v267_v39 = vld [vmem:[#allocation2 + $0x70] sm:$0xff]  ;;  %v268_v40 = vld [vmem:[#allocation2 + $0x78] sm:$0xff]  ;;  %v584_v42 = vld [vmem:[%s1022_s0 + $0x2] sm:$0x3] }
  0x41   :  { %v733_v41 = vpack.c.bf16 %v268_v40, %v267_v39  ;;  %v161_v43 = vld [vmem:[#allocation5 + $0x40] sm:$0xff]  ;;  %v163_v44 = vld [vmem:[#allocation5 + $0x50] sm:$0xff]  ;;  %v166_v46 = vld [vmem:[#allocation5 + $0x68] sm:$0xff] }
  0x42   :  { %v701_v45 = vpack.c.bf16 %v163_v44, %v161_v43  ;;  %v168_v47 = vld [vmem:[#allocation5 + $0x78] sm:$0xff]  ;;  %v165_v49 = vld [vmem:[#allocation5 + $0x60] sm:$0xff]  ;;  %v167_v50 = vld [vmem:[#allocation5 + $0x70] sm:$0xff] }
  0x43   :  { %687 = vmatpush3.bf16.msra.mxu0 %v686_v15  ;;  %698 = vmatpush1.bf16.msra.mxu1 %v697_v26  ;;  %v703_v48 = vpack.c.bf16 %v168_v47, %v166_v46  ;;  %v705_v51 = vpack.c.bf16 %v167_v50, %v165_v49  ;;  %v170_v52 = vld [vmem:[#allocation5 + $0x88] sm:$0xff]  ;;  %v172_v53 = vld [vmem:[#allocation5 + $0x98] sm:$0xff]  ;;  %v169_v57 = vld [vmem:[#allocation5 + $0x80] sm:$0xff] }
  0x44   :  { %688 = vmatprep.subr.bf16.mxu0 %v915_v0  ;;  %700 = vmatprep.subr.bf16.mxu1 %v699_v28  ;;  %v352_v54 = vld [vmem:[#allocation5 + $0x108] sm:$0xff]  ;;  %v707_v55 = vpack.c.bf16 %v172_v53, %v170_v52  ;;  %v354_v56 = vld [vmem:[#allocation5 + $0x118] sm:$0xff]  ;;  %v171_v58 = vld [vmem:[#allocation5 + $0x90] sm:$0xff] }
  0x45   :  { %v735_v59 = vpack.c.bf16 %v354_v56, %v352_v54  ;;  %v709_v60 = vpack.c.bf16 %v171_v58, %v169_v57  ;;  %v351_v61 = vld [vmem:[#allocation5 + $0x100] sm:$0xff]  ;;  %v353_v62 = vld [vmem:[#allocation5 + $0x110] sm:$0xff]  ;;  %v356_v2 = vld [vmem:[#allocation5 + $0x128] sm:$0xff] }
  0x46   :  { %v737_v63 = vpack.c.bf16 %v353_v62, %v351_v61  ;;  %v358_v4 = vld [vmem:[#allocation5 + $0x138] sm:$0xff]  ;;  %v173_v5 = vld [vmem:[#allocation5 + $0xa0] sm:$0xff]  ;;  %v175_v6 = vld [vmem:[#allocation5 + $0xb0] sm:$0xff] }
  0x47   :  { %690 = vmatpush3.bf16.msra.mxu0 %v689_v27  ;;  %702 = vmatpush1.bf16.msra.mxu1 %v701_v45  ;;  %v739_v7 = vpack.c.bf16 %v358_v4, %v356_v2  ;;  %v713_v8 = vpack.c.bf16 %v175_v6, %v173_v5  ;;  %v355_v9 = vld [vmem:[#allocation5 + $0x120] sm:$0xff]  ;;  %v357_v10 = vld [vmem:[#allocation5 + $0x130] sm:$0xff]  ;;  %v178_v12 = vld [vmem:[#allocation5 + $0xc8] sm:$0xff] }
  0x48   :  { %723 = vmatprep.subr.bf16.mxu0 %v915_v0  ;;  %704 = vmatprep.subr.bf16.mxu1 %v703_v48  ;;  %v741_v11 = vpack.c.bf16 %v357_v10, %v355_v9  ;;  %v180_v13 = vld [vmem:[#allocation5 + $0xd8] sm:$0xff]  ;;  %v360_v14 = vld [vmem:[#allocation5 + $0x148] sm:$0xff]  ;;  %v177_v17 = vld [vmem:[#allocation5 + $0xc0] sm:$0xff] }
  0x49   :  { %v715_v15 = vpack.c.bf16 %v180_v13, %v178_v12  ;;  %v362_v16 = vld [vmem:[#allocation5 + $0x158] sm:$0xff]  ;;  %v179_v18 = vld [vmem:[#allocation5 + $0xd0] sm:$0xff]  ;;  %v359_v21 = vld [vmem:[#allocation5 + $0x140] sm:$0xff] }
  0x4a   :  { %658 = vmatmul.mubr.msk.f32.vlgmr.msra.gmra.mrb[0].mxu0 %vm71_vm1, %v62_v31  ;;  %v743_v19 = vpack.c.bf16 %v362_v16, %v360_v14  ;;  %v717_v20 = vpack.c.bf16 %v179_v18, %v177_v17  ;;  %v361_v22 = vld [vmem:[#allocation5 + $0x150] sm:$0xff]  ;;  %v182_v24 = vld [vmem:[#allocation5 + $0xe8] sm:$0xff]  ;;  %v184_v25 = vld [vmem:[#allocation5 + $0xf8] sm:$0xff] }
  0x4b   :  { %725 = vmatpush3.bf16.msra.mxu0 %v724_v32  ;;  %676 = vmatprep.mubr.msk.f32.mxu0 %vm916_vm0, %v917_v1  ;;  %v745_v23 = vpack.c.bf16 %v361_v22, %v359_v21  ;;  %v364_v26 = vld [vmem:[#allocation5 + $0x168] sm:$0xff]  ;;  %v719_v27 = vpack.c.bf16 %v184_v25, %v182_v24  ;;  %v366_v28 = vld [vmem:[#allocation5 + $0x178] sm:$0xff]  ;;  %v181_v29 = vld [vmem:[#allocation5 + $0xe0] sm:$0xff] }
  0x4c   :  { %726 = vmatprep.subr.bf16.mxu0 %v915_v0  ;;  %706 = vmatpush1.bf16.msra.mxu1 %v705_v51  ;;  %v183_v30 = vld [vmem:[#allocation5 + $0xf0] sm:$0xff]  ;;  %v747_v31 = vpack.c.bf16 %v366_v28, %v364_v26  ;;  %v363_v33 = vld [vmem:[#allocation5 + $0x160] sm:$0xff]  ;;  %v368_v36 = vld [vmem:[#allocation5 + $0x188] sm:$0xff] }
  0x4d   :  { %708 = vmatprep.subr.bf16.mxu1 %v707_v55  ;;  %v721_v32 = vpack.c.bf16 %v183_v30, %v181_v29  ;;  %v365_v34 = vld [vmem:[#allocation5 + $0x170] sm:$0xff]  ;;  %v370_v37 = vld [vmem:[#allocation5 + $0x198] sm:$0xff]  ;;  %v367_v39 = vld [vmem:[#allocation5 + $0x180] sm:$0xff] }
  0x4e   :  { %v369_v40 = vld [vmem:[#allocation5 + $0x190] sm:$0xff]  ;;  %v374_v43 = vld [vmem:[#allocation5 + $0x1b8] sm:$0xff]  ;;  %v371_v45 = vld [vmem:[#allocation5 + $0x1a0] sm:$0xff] }
  0x4f   :  { %728 = vmatpush3.bf16.msra.mxu0 %v727_v35  ;;  %v749_v35 = vpack.c.bf16 %v365_v34, %v363_v33  ;;  %v373_v46 = vld [vmem:[#allocation5 + $0x1b0] sm:$0xff]  ;;  %v376_v48 = vld [vmem:[#allocation5 + $0x1c8] sm:$0xff]  ;;  %v378_v49 = vld [vmem:[#allocation5 + $0x1d8] sm:$0xff] }
  0x50   :  { %729 = vmatprep.subr.bf16.mxu0 %v915_v0  ;;  %710 = vmatpush1.bf16.msra.mxu1 %v709_v60  ;;  %v757_v47 = vpack.c.bf16 %v373_v46, %v371_v45  ;;  %v759_v50 = vpack.c.bf16 %v378_v49, %v376_v48  ;;  %v375_v51 = vld [vmem:[#allocation5 + $0x1c0] sm:$0xff]  ;;  %v377_v52 = vld [vmem:[#allocation5 + $0x1d0] sm:$0xff]  ;;  %v380_v54 = vld [vmem:[#allocation5 + $0x1e8] sm:$0xff] }
  0x51   :  { %v761_v53 = vpack.c.bf16 %v377_v52, %v375_v51  ;;  %v382_v55 = vld [vmem:[#allocation5 + $0x1f8] sm:$0xff]  ;;  %v379_v57 = vld [vmem:[#allocation5 + $0x1e0] sm:$0xff]  ;;  %v381_v58 = vld [vmem:[#allocation5 + $0x1f0] sm:$0xff] }
  0x52   :  { %v763_v56 = vpack.c.bf16 %v382_v55, %v380_v54  ;;  %v472_v60 = vld [vmem:[#allocation7 + $0x80] sm:$0xff]  ;;  %v473_v61 = vld [vmem:[#allocation7 + $0x88] sm:$0xff]  ;;  %v475_v12 = vld [vmem:[#allocation7 + $0x98] sm:$0xff] }
  0x53   :  { %731 = vmatpush3.bf16.msra.mxu0 %v730_v38  ;;  %v751_v38 = vpack.c.bf16 %v370_v37, %v368_v36  ;;  %v767_v62 = vpack.c.bf16 %v473_v61, %v472_v60  ;;  %v457_v9 = vld [vmem:[#allocation7 + $0x8] sm:$0xff]  ;;  %v458_v18 = vld [vmem:[#allocation7 + $0x10] sm:$0xff]  ;;  %v460_v24 = vld [vmem:[#allocation7 + $0x20] sm:$0xff] }
  0x54   :  { %732 = vmatprep.subr.bf16.mxu0 %v915_v0  ;;  %v174_v0 = vld [vmem:[#allocation5 + $0xa8] sm:$0xff]  ;;  %v479_v33 = vld [vmem:[#allocation7 + $0xb8] sm:$0xff]  ;;  %v484_v49 = vld [vmem:[#allocation7 + $0xe0] sm:$0xff] }
  0x55   :  { %v477_v21 = vld [vmem:[#allocation7 + $0xa8] sm:$0xff]  ;;  %v463_v36 = vld [vmem:[#allocation7 + $0x38] sm:$0xff] }
  0x56   :  { %v461_v25 = vld [vmem:[#allocation7 + $0x28] sm:$0xff]  ;;  %v467_v48 = vld [vmem:[#allocation7 + $0x58] sm:$0xff] }
  0x57   :  { %734 = vmatpush3.bf16.msra.mxu0 %v733_v41  ;;  %v753_v41 = vpack.c.bf16 %v369_v40, %v367_v39  ;;  %v777_v26 = vpack.c.bf16 %v461_v25, %v460_v24  ;;  %v481_v39 = vld [vmem:[#allocation7 + $0xc8] sm:$0xff]  ;;  %v464_v40 = vld [vmem:[#allocation7 + $0x40] sm:$0xff]  ;;  %v471_v60 = vld [vmem:[#allocation7 + $0x78] sm:$0xff] }
  0x58   :  { %736 = vmatprep.subr.bf16.mxu0 %v735_v59  ;;  %v765_v59 = vpack.c.bf16 %v381_v58, %v379_v57  ;;  %v469_v54 = vld [vmem:[#allocation7 + $0x68] sm:$0xff]  ;;  %v487_v57 = vld [vmem:[#allocation7 + $0xf8] sm:$0xff] }
  0x5a   :  { %677 = vmatmul.mubr.msk.f32.vlgmr.msra.gmra.mrb[2].mxu0 %vm71_vm1, %v584_v42  ;;  %v372_v42 = vld [vmem:[#allocation5 + $0x1a8] sm:$0xff] }
  0x5b   :  { %447 = vmatprep.mubr.f32.mxu0 %v917_v1  ;;  %v176_v1 = vld [vmem:[#allocation5 + $0xb8] sm:$0xff]  ;;  %738 = vmatpush1.bf16.msra.mxu0 %v737_v63  ;;  %v755_v44 = vpack.c.bf16 %v374_v43, %v372_v42  ;;  %v465_v42 = vld [vmem:[#allocation7 + $0x48] sm:$0xff]  ;;  %v482_v43 = vld [vmem:[#allocation7 + $0xd0] sm:$0xff] }
  0x5c   :  { %v711_v3 = vpack.c.bf16 %v176_v1, %v174_v0  ;;  %740 = vmatprep.subr.bf16.mxu0 %v739_v7  ;;  %v785_v45 = vpack.c.bf16 %v465_v42, %v464_v40 }
  0x5e   :  { %712 = vmatprep.subr.bf16.mxu1 %v711_v3 }
  0x5f   :  { %714 = vmatpush1.bf16.msra.mxu1 %v713_v8  ;;  %742 = vmatpush1.bf16.msra.mxu0 %v741_v11  ;;  %v456_v8 = vld [vmem:[#allocation7] sm:$0xff]  ;;  %v474_v11 = vld [vmem:[#allocation7 + $0x90] sm:$0xff] }
  0x60   :  { %716 = vmatprep.subr.bf16.mxu1 %v715_v15  ;;  %744 = vmatprep.subr.bf16.mxu0 %v743_v19  ;;  %v769_v15 = vpack.c.bf16 %v457_v9, %v456_v8  ;;  %v771_v17 = vpack.c.bf16 %v475_v12, %v474_v11  ;;  %v459_v19 = vld [vmem:[#allocation7 + $0x18] sm:$0xff] }
  0x61   :  { %v773_v22 = vpack.c.bf16 %v459_v19, %v458_v18 }
  0x63   :  { %718 = vmatpush1.bf16.msra.mxu1 %v717_v20  ;;  %746 = vmatpush1.bf16.msra.mxu0 %v745_v23  ;;  %v476_v20 = vld [vmem:[#allocation7 + $0xa0] sm:$0xff] }
  0x64   :  { %720 = vmatprep.subr.bf16.mxu1 %v719_v27  ;;  %748 = vmatprep.subr.bf16.mxu0 %v747_v31  ;;  %v775_v23 = vpack.c.bf16 %v477_v21, %v476_v20 }
  0x67   :  { %722 = vmatpush1.bf16.msra.mxu1 %v721_v32  ;;  %750 = vmatpush1.bf16.msra.mxu0 %v749_v35  ;;  %v478_v32 = vld [vmem:[#allocation7 + $0xb0] sm:$0xff] }
  0x68   :  { %752 = vmatprep.subr.bf16.mxu0 %v751_v38  ;;  %768 = vmatprep.subr.bf16.mxu1 %v767_v62  ;;  %v779_v34 = vpack.c.bf16 %v479_v33, %v478_v32  ;;  %v462_v35 = vld [vmem:[#allocation7 + $0x30] sm:$0xff]  ;;  %v480_v38 = vld [vmem:[#allocation7 + $0xc0] sm:$0xff] }
  0x69   :  { %v781_v37 = vpack.c.bf16 %v463_v36, %v462_v35 }
  0x6b   :  { %754 = vmatpush1.bf16.msra.mxu0 %v753_v41  ;;  %v783_v41 = vpack.c.bf16 %v481_v39, %v480_v38 }
  0x6c   :  { %756 = vmatprep.subr.bf16.mxu0 %v755_v44  ;;  %v483_v44 = vld [vmem:[#allocation7 + $0xd8] sm:$0xff] }
  0x6d   :  { %v787_v46 = vpack.c.bf16 %v483_v44, %v482_v43 }
  0x6f   :  { %758 = vmatpush1.bf16.msra.mxu0 %v757_v47  ;;  %v466_v47 = vld [vmem:[#allocation7 + $0x50] sm:$0xff] }
  0x70   :  { %760 = vmatprep.subr.bf16.mxu0 %v759_v50  ;;  %v485_v50 = vld [vmem:[#allocation7 + $0xe8] sm:$0xff]  ;;  %v789_v51 = vpack.c.bf16 %v467_v48, %v466_v47 }
  0x71   :  { %v791_v52 = vpack.c.bf16 %v485_v50, %v484_v49 }
  0x73   :  { %762 = vmatpush1.bf16.msra.mxu0 %v761_v53  ;;  %v468_v53 = vld [vmem:[#allocation7 + $0x60] sm:$0xff] }
  0x74   :  { %764 = vmatprep.subr.bf16.mxu0 %v763_v56  ;;  %v793_v55 = vpack.c.bf16 %v469_v54, %v468_v53  ;;  %v486_v56 = vld [vmem:[#allocation7 + $0xf0] sm:$0xff] }
  0x75   :  { %v795_v58 = vpack.c.bf16 %v487_v57, %v486_v56 }
  0x77   :  { %766 = vmatpush1.bf16.msra.mxu0 %v765_v59  ;;  %v470_v59 = vld [vmem:[#allocation7 + $0x70] sm:$0xff] }
  0x78   :  { %v797_v61 = vpack.c.bf16 %v471_v60, %v470_v59 }
 0x11d   :  { %v141_v63 = vpop.f32.mrb[0].mxu0 }
 0x11e   :  { %v145_v0 = vmin.f32 %v141_v63, 0.0  ;;  %v659_v1 = vpop.f32.mrb[1].mxu0  ;;  %vm150_vm2 = vcmp.gt.f32.partialorder %v141_v63, 0.0 }
 0x120   :  { %v146_v2 = vmul.f32 1.442695, %v145_v0 }
 0x122   :  { %810 = vpow2.f32 %v146_v2 }
 0x12c   :  { %v811_v3 = vpop.eup %810 }
 0x12d   :  { %v583_v4 = vadd.f32 -1.0, %v811_v3  ;;  %v338_v5 = vpop.f32.mrb[2].mxu0 }
 0x12e   :  { %v342_v6 = vmin.f32 %v338_v5, 0.0  ;;  %v678_v7 = vpop.f32.mrb[3].mxu0  ;;  %vm347_vm3 = vcmp.gt.f32.partialorder %v338_v5, 0.0 }
 0x12f   :  { %v149_v10 = vmul.f32 1.6732632, %v583_v4  ;;  %v587_v7 = vld [vmem:[%s1026_s4] ss:$0 sm:$0xff] }
 0x130   :  { %v343_v13 = vmul.f32 1.442695, %v342_v6 }
 0x131   :  { %v151_v14 = vsel %vm150_vm2, %v141_v63, %v149_v10 }
 0x132   :  { %v152_v16 = vmul.f32 1.050701, %v151_v14  ;;  %812 = vpow2.f32 %v343_v13 }
 0x134   :  { %250 = vmatmul.mubr.f32.vlgmr.msra.gmra.mrb[0].mxu1 %v152_v16 }
 0x135   :  { %770 = vmatpush3.bf16.msra.mxu1 %v769_v15 }
 0x136   :  { %772 = vmatprep.subr.bf16.mxu1 %v771_v17 }
 0x139   :  { %774 = vmatpush3.bf16.msra.mxu1 %v773_v22 }
 0x13a   :  { %776 = vmatprep.subr.bf16.mxu1 %v775_v23 }
 0x13c   :  { %v813_v27 = vpop.eup %812 }
 0x13d   :  { %v586_v28 = vadd.f32 -1.0, %v813_v27  ;;  %778 = vmatpush3.bf16.msra.mxu1 %v777_v26 }
 0x13e   :  { %780 = vmatprep.subr.bf16.mxu1 %v779_v34 }
 0x13f   :  { %v346_v29 = vmul.f32 1.6732632, %v586_v28 }
 0x141   :  { %v348_v30 = vsel %vm347_vm3, %v338_v5, %v346_v29  ;;  %782 = vmatpush3.bf16.msra.mxu1 %v781_v37 }
 0x142   :  { %v349_v31 = vmul.f32 1.050701, %v348_v30  ;;  %784 = vmatprep.subr.bf16.mxu1 %v783_v41 }
 0x144   :  { %448 = vmatmul.mubr.f32.vlgmr.msra.gmra.mrb[4].mxu0 %v349_v31 }
 0x145   :  { %786 = vmatpush3.bf16.msra.mxu1 %v785_v45 }
 0x146   :  { %788 = vmatprep.subr.bf16.mxu1 %v787_v46 }
 0x149   :  { %790 = vmatpush3.bf16.msra.mxu1 %v789_v51 }
 0x14a   :  { %792 = vmatprep.subr.bf16.mxu1 %v791_v52 }
 0x14d   :  { %794 = vmatpush3.bf16.msra.mxu1 %v793_v55 }
 0x14e   :  { %796 = vmatprep.subr.bf16.mxu1 %v795_v58 }
 0x151   :  { %798 = vmatpush3.bf16.msra.mxu1 %v797_v61 }
 0x207   :  { %v251_v62 = vpop.f32.mrb[0].mxu1 }
 0x208   :  { %v253_v63 = vpop.f32.mrb[1].mxu1  ;;  %v256_v0 = vmul.f32 2.0, %v251_v62 }
 0x209   :  { %v257_v1 = vmul.f32 2.0, %v253_v63 }
 0x217   :  { %v449_v2 = vpop.f32.mrb[4].mxu0 }
 0x218   :  { %v454_v3 = vadd.f32 %v449_v2, %v256_v0  ;;  %v451_v4 = vpop.f32.mrb[5].mxu0 }
 0x219   :  { %v455_v5 = vadd.f32 %v451_v4, %v257_v1 }
 0x21b   :  { %559 = vmatprep.mubr.f32.mxu1 %v455_v5 }
 0x21c   :  { %560 = vmatmul.mubr.f32.vlgmr.msra.gmra.mrb[2].mxu1 %v454_v3 }
 0x2ef   :  { %v638_v6 = vpop.f32.mrb[2].mxu1 }
 0x2f0   :  { %v639_v8 = vpop.f32.mrb[3].mxu1 }
 0x2f1   :  { %v640_v9 = vadd.f32 %v639_v8, %v638_v6 }
 0x2f3   :  { %v562_v10 = vadd.f32 %v640_v9, %v587_v7 }
 0x2f5   :  { %565 = vst [vmem:[#allocation8] sm:$0x3] %v562_v10 }
 0x2f6   :  { %891 = shalt.err (!%p888_p0)
}
 0x2f7   :  { %s892_s15 = scalar_lea.hbm %s1027_s5, 32 }
 0x2f8   :  { %p893_p1 = scmp.ne.s32.totalorder %s1027_s5, %s892_s15  ;;  %p896_p2 = scmp.lt.u32.totalorder %s892_s15, %s1027_s5 }
 0x2fa   :  { %p898_p3 = pnand %p896_p2, %p893_p1 }
 0x2fc   :  { %901 = shalt.err (!%p898_p3)
}
 0x2fd   :  { %575 = dma.vmem_to_hbm [thread:$0]  %s573_s11, 32, %s1027_s5, [#allocation4]  }
 0x2fe   :  { %906 = dma.done.wait [#allocation4], 32  }
 0x2ff   :  { %907 = vsyncadd [#allocation4], 4294967264 }
 0x300   :  { %579 = vsyncpa [#allocation3], 1 }
 0x301   :  { %580 = vsyncpa [#allocation6], 1 }
 0x302   :  { %581 = vsyncpa [#allocation4], 1 }

</bundles_post_ra>
